<compile_context>
chip_gen: v7x
topology: tpu7x:2x2x1
jax: 0.10.0
libtpu: 0.0.40
codegen_flags: <defaults>
</compile_context>

<pallas_src>
import functools

import jax
import jax.numpy as jnp
from jax.experimental import pallas as pl
from jax.experimental.pallas import tpu as pltpu


def _round_up(n, m):
    return ((n + m - 1) // m) * m


def _largest_divisor_leq(n, cap):
    best = 1
    for d in range(1, n + 1):
        if n % d == 0 and d <= cap:
            best = d
    return best


def _lstm_block_kernel(x_ref, wih_ref, whh_ref, b_ref, wfc_ref, bfc_ref,
                       out_ref, gx_ref, h_ref, c_ref):
    """One (batch block, time block) grid step of the LSTM recurrence.

    x_ref  : (Tt, Bt, I_p)   time-major input block (f32)
    wih_ref: (I_p, 4H_p)     W_ih^T (f32, resident)
    whh_ref: (H_p, 4H_p)     W_hh^T (bf16 or f32, resident)
    b_ref  : (1, 4H_p)       b_ih + b_hh (f32, resident)
    wfc_ref: (H_p, O_p)      W_fc^T (f32, resident)
    bfc_ref: (1, O_p)
    out_ref: (Bt, O_p)       written only on the last time block
    gx_ref : (Tt, Bt, 4H_p)  VMEM scratch: per-block input projection
    h_ref/c_ref: (Bt, H_p)   VMEM scratch carry across time blocks (f32)
    """
    t_blk = pl.program_id(1)
    n_t = pl.num_programs(1)

    Tt, Bt, I_p = x_ref.shape
    H = whh_ref.shape[0]          # padded hidden size (multiple of 128)
    mm_dtype = whh_ref.dtype      # recurrent-matmul operand dtype

    @pl.when(t_blk == 0)
    def _init():
        h_ref[...] = jnp.zeros_like(h_ref)
        c_ref[...] = jnp.zeros_like(c_ref)

    # Input projection for the whole time block: one batched MXU matmul, off the
    # serial per-timestep path.  Stored to VMEM scratch so the serial loop reads
    # one contiguous (Bt, 4H) slab per step.
    x_blk = x_ref[...].reshape(Tt * Bt, I_p)
    gx = jnp.dot(x_blk, wih_ref[...], preferred_element_type=jnp.float32)
    gx_ref[...] = (gx + b_ref[...]).reshape(Tt, Bt, 4 * H)

    def sigmoid(z):
        # tanh identity -> single EUP push per sigmoid (vs exp + reciprocal);
        # the extra mul/add lands on the VALU which has slack.
        return 0.5 * jnp.tanh(0.5 * z) + 0.5

    def step(tt, carry):
        h_prev, c_prev = carry
        # Only this h-dependent matmul sits on the serial critical path.
        gates = gx_ref[tt] + jnp.dot(h_prev.astype(mm_dtype), whh_ref[...],
                                     preferred_element_type=jnp.float32)
        i_g = sigmoid(gates[:, 0 * H:1 * H])
        f_g = sigmoid(gates[:, 1 * H:2 * H])
        g_g = jnp.tanh(gates[:, 2 * H:3 * H])
        o_g = sigmoid(gates[:, 3 * H:4 * H])
        c_new = f_g * c_prev + i_g * g_g
        h_new = o_g * jnp.tanh(c_new)
        return h_new, c_new

    # Small per-block loop, fully unrolled for LLO scheduling visibility.
    h_fin, c_fin = jax.lax.fori_loop(0, Tt, step, (h_ref[...], c_ref[...]),
                                     unroll=True)
    h_ref[...] = h_fin
    c_ref[...] = c_fin

    @pl.when(t_blk == n_t - 1)
    def _epilogue():
        out_ref[...] = (jnp.dot(h_fin, wfc_ref[...],
                                preferred_element_type=jnp.float32)
                        + bfc_ref[...]).astype(out_ref.dtype)


def rnn_action_to_observation(x, params, *, matmul_dtype=jnp.bfloat16,
                              time_block=None, batch_block=8):
    """x: (B, T, input_size) f32, batch_first like PyTorch. Returns (B, output_size)."""
    w_ih_t = params["w_ih_t"]    # (I, 4H)
    w_hh_t = params["w_hh_t"]    # (H, 4H)
    b = params["b"]              # (1, 4H)  (= b_ih + b_hh)
    w_fc_t = params["w_fc_t"]    # (H, O)
    b_fc = params["b_fc"]        # (1, O)

    B, T, I = x.shape
    H = w_hh_t.shape[0]
    O = w_fc_t.shape[1]

    # TPU-friendly padding: batch -> multiple of 8 sublanes; hidden/input/output ->
    # multiples of 128 lanes (each gate then occupies whole lane tiles, stores are
    # lane-dense).  Padded gate columns/bias are zero, so padded h/c lanes stay exactly
    # 0 and padded W_fc rows contribute nothing.
    B_p = _round_up(max(B, 8), 8)
    H_p = _round_up(max(H, 128), 128)
    G_p = 4 * H_p
    I_p = _round_up(max(I, 128), 128)
    O_p = _round_up(max(O, 128), 128)

    # Batch block (leading "parallel" grid axis; megacore split on v7x).
    Bt = max(8, _round_up(min(batch_block, B_p), 8))
    if B_p % Bt != 0:
        Bt = 8  # 8 always divides B_p

    # Time block: largest divisor of T fitting a VMEM budget (double-buffered x block
    # + per-block gx scratch).
    if time_block is None:
        budget = 4 * 1024 * 1024
        per_t_bytes = 4 * Bt * (G_p + 2 * I_p)
        Tt = _largest_divisor_leq(T, max(1, budget // per_t_bytes))
    else:
        if T % time_block != 0:
            raise ValueError("time_block must divide T")
        Tt = time_block

    def pad_gate_cols(w):  # (rows, 4H) -> (rows, 4H_p), per-gate column blocks
        out = jnp.zeros((w.shape[0], G_p), jnp.float32)
        for g in range(4):
            out = out.at[:, g * H_p:g * H_p + H].set(w[:, g * H:(g + 1) * H])
        return out

    w_ih_p = jnp.zeros((I_p, G_p), jnp.float32).at[:I, :].set(pad_gate_cols(w_ih_t))
    w_hh_p = jnp.zeros((H_p, G_p), jnp.float32).at[:H, :].set(pad_gate_cols(w_hh_t))
    w_hh_p = w_hh_p.astype(matmul_dtype)   # bf16 operands -> single-pass MXU per step
    b_p = pad_gate_cols(b)                                            # (1, 4H_p)
    w_fc_p = jnp.zeros((H_p, O_p), jnp.float32).at[:H, :O].set(w_fc_t)
    b_fc_p = jnp.zeros((1, O_p), jnp.float32).at[:, :O].set(b_fc)

    # Time-major, padded x: (T, B_p, I_p).  x is read from HBM exactly once; the input
    # projection itself is fused into the kernel (no (T, B, 4H) gx tensor in HBM).
    x_tm = jnp.zeros((T, B_p, I_p), jnp.float32).at[:, :B, :I].set(
        jnp.transpose(x.astype(jnp.float32), (1, 0, 2)))

    # Explicit VMEM budget (v7x: 64 MiB physical, 32 MiB default scoped).
    whh_bytes = H_p * G_p * jnp.dtype(matmul_dtype).itemsize
    est = (2 * Tt * Bt * I_p * 4          # double-buffered x blocks
           + Tt * Bt * G_p * 4            # gx scratch
           + 2 * Bt * H_p * 4             # h, c scratch
           + I_p * G_p * 4 + whh_bytes    # W_ih, W_hh (resident)
           + G_p * 4 + H_p * O_p * 4 + O_p * 4
           + 2 * Bt * O_p * 4)            # output block
    vmem_limit = int(min(max(2 * est, 16 * 1024 * 1024), 100 * 1024 * 1024))

    grid = (B_p // Bt, T // Tt)

    out_p = pl.pallas_call(
        _lstm_block_kernel,
        out_shape=jax.ShapeDtypeStruct((B_p, O_p), jnp.float32),
        grid_spec=pltpu.PrefetchScalarGridSpec(
            num_scalar_prefetch=0,
            grid=grid,
            in_specs=[
                pl.BlockSpec((Tt, Bt, I_p), lambda bb, tb: (tb, bb, 0)),  # x block
                pl.BlockSpec((I_p, G_p), lambda bb, tb: (0, 0)),          # W_ih^T
                pl.BlockSpec((H_p, G_p), lambda bb, tb: (0, 0)),          # W_hh^T
                pl.BlockSpec((1, G_p), lambda bb, tb: (0, 0)),            # bias
                pl.BlockSpec((H_p, O_p), lambda bb, tb: (0, 0)),          # W_fc^T
                pl.BlockSpec((1, O_p), lambda bb, tb: (0, 0)),            # b_fc
            ],
            out_specs=pl.BlockSpec((Bt, O_p), lambda bb, tb: (bb, 0)),
            scratch_shapes=[
                pltpu.VMEM((Tt, Bt, G_p), jnp.float32),   # gx block
                pltpu.VMEM((Bt, H_p), jnp.float32),       # h carry
                pltpu.VMEM((Bt, H_p), jnp.float32),       # c carry
            ],
        ),
        compiler_params=pltpu.CompilerParams(
            dimension_semantics=("parallel", "arbitrary"),
            vmem_limit_bytes=vmem_limit),
    )(x_tm, w_ih_p, w_hh_p, b_p, w_fc_p, b_fc_p)

    return out_p[:B, :O]


def _reference_forward(x, params):
    """Pure-JAX reference replicating torch.nn.LSTM + Linear semantics."""
    w_ih_t, w_hh_t, b = params["w_ih_t"], params["w_hh_t"], params["b"]
    w_fc_t, b_fc = params["w_fc_t"], params["b_fc"]
    B, T, I = x.shape
    H = w_hh_t.shape[0]
    hp = jax.lax.Precision.HIGHEST
    h = jnp.zeros((B, H), jnp.float32)
    c = jnp.zeros((B, H), jnp.float32)
    for t in range(T):
        gates = (jnp.dot(x[:, t, :], w_ih_t, precision=hp)
                 + jnp.dot(h, w_hh_t, precision=hp) + b)
        i_g = jax.nn.sigmoid(gates[:, 0:H])
        f_g = jax.nn.sigmoid(gates[:, H:2 * H])
        g_g = jnp.tanh(gates[:, 2 * H:3 * H])
        o_g = jax.nn.sigmoid(gates[:, 3 * H:4 * H])
        c = f_g * c + i_g * g_g
        h = o_g * jnp.tanh(c)
    return jnp.dot(h, w_fc_t, precision=hp) + b_fc


def init_params(key, input_size, hidden_size, output_size):
    """Deterministic init mirroring PyTorch's uniform(-1/sqrt(H), 1/sqrt(H))."""
    ks = jax.random.split(key, 6)
    bound = 1.0 / jnp.sqrt(jnp.float32(hidden_size))
    u = lambda k, shape: jax.random.uniform(k, shape, jnp.float32, -bound, bound)
    w_ih = u(ks[0], (4 * hidden_size, input_size))
    w_hh = u(ks[1], (4 * hidden_size, hidden_size))
    b_ih = u(ks[2], (4 * hidden_size,))
    b_hh = u(ks[3], (4 * hidden_size,))
    w_fc = u(ks[4], (output_size, hidden_size))
    b_fc = u(ks[5], (output_size,))
    return {
        "w_ih_t": w_ih.T,                 # (I, 4H)
        "w_hh_t": w_hh.T,                 # (H, 4H)
        "b": (b_ih + b_hh)[None, :],      # (1, 4H)
        "w_fc_t": w_fc.T,                 # (H, O)
        "b_fc": b_fc[None, :],            # (1, O)
    }


if __name__ == "__main__":
    batch, seq, input_size, hidden_size, output_size = 2, 8, 4, 32, 16

    key = jax.random.PRNGKey(0)
    kx, kp = jax.random.split(key)
    x = jax.random.normal(kx, (batch, seq, input_size), jnp.float32)
    params = init_params(kp, input_size, hidden_size, output_size)

    ref = _reference_forward(x, params)

    # 1) f32 recurrent matmul, two time blocks (exercises the grid-carried h/c scratch).
    fwd_f32 = jax.jit(functools.partial(rnn_action_to_observation,
                                        matmul_dtype=jnp.float32, time_block=4))
    out_f32 = jax.block_until_ready(fwd_f32(x, params))
    assert out_f32.shape == (batch, output_size)
    assert jnp.allclose(out_f32, ref, atol=1e-4, rtol=1e-4), (
        f"f32 path max abs err {jnp.max(jnp.abs(out_f32 - ref))}")

    # 2) Default perf config: bf16 recurrent-matmul operands (f32 accumulation/carry),
    #    auto time block.  Looser tolerance accounts for bf16 operand rounding.
    fwd_bf16 = jax.jit(rnn_action_to_observation)
    out_bf16 = jax.block_until_ready(fwd_bf16(x, params))
    assert out_bf16.shape == (batch, output_size)
    assert jnp.allclose(out_bf16, ref, atol=2e-2, rtol=2e-2), (
        f"bf16 path max abs err {jnp.max(jnp.abs(out_bf16 - ref))}")

    print("KERNEL_OK")
</pallas_src>

<mosaic_0001>
module attributes {stable_mosaic.version = 11 : i64} {
  func.func @_lstm_block_kernel(%arg0: i32, %arg1: i32, %arg2: memref<4x8x128xf32, #tpu.memory_space<vmem>>, %arg3: memref<128x512xf32, #tpu.memory_space<vmem>>, %arg4: memref<128x512xf32, #tpu.memory_space<vmem>>, %arg5: memref<1x512xf32, #tpu.memory_space<vmem>>, %arg6: memref<128x128xf32, #tpu.memory_space<vmem>>, %arg7: memref<1x128xf32, #tpu.memory_space<vmem>>, %arg8: memref<8x128xf32, #tpu.memory_space<vmem>>, %arg9: memref<4x8x512xf32, #tpu.memory_space<vmem>>, %arg10: memref<8x128xf32, #tpu.memory_space<vmem>>, %arg11: memref<8x128xf32, #tpu.memory_space<vmem>>) attributes {dimension_semantics = [#tpu.dimension_semantics<parallel>, #tpu.dimension_semantics<arbitrary>], iteration_bounds = array<i64: 1, 2>, scalar_prefetch = 0 : i64, scratch_operands = 3 : i64, tpu.core_type = #tpu.core_type<tc>, window_params = [{transform_indices = @transform_0, window_bounds = array<i64: 4, 8, 128>}, {pipeline_mode = #tpu.pipeline_mode<synchronous>, transform_indices = @transform_1, window_bounds = array<i64: 128, 512>}, {pipeline_mode = #tpu.pipeline_mode<synchronous>, transform_indices = @transform_2, window_bounds = array<i64: 128, 512>}, {pipeline_mode = #tpu.pipeline_mode<synchronous>, transform_indices = @transform_3, window_bounds = array<i64: 1, 512>}, {pipeline_mode = #tpu.pipeline_mode<synchronous>, transform_indices = @transform_4, window_bounds = array<i64: 128, 128>}, {pipeline_mode = #tpu.pipeline_mode<synchronous>, transform_indices = @transform_5, window_bounds = array<i64: 1, 128>}, {transform_indices = @transform_6, window_bounds = array<i64: 8, 128>}]} {
    %c0_i32 = arith.constant 0 : i32
    %0 = arith.cmpi eq, %arg1, %c0_i32 : i32
    %1 = arith.extui %0 : i1 to i32
    %c0_i32_0 = arith.constant 0 : i32
    %2 = arith.cmpi ne, %1, %c0_i32_0 : i32
    scf.if %2 {
      %cst_77 = arith.constant 0.000000e+00 : f32
      %167 = vector.broadcast %cst_77 : f32 to vector<8x128xf32>
      %c0_78 = arith.constant 0 : index
      %c0_79 = arith.constant 0 : index
      %168 = vector.load %arg10[%c0_78, %c0_79] : memref<8x128xf32, #tpu.memory_space<vmem>>, vector<8x128xf32>
      tpu.vector_store %arg10[%c0_78, %c0_79], %167 {strides = array<i32>} : memref<8x128xf32, #tpu.memory_space<vmem>>, vector<8x128xf32>,
      %cst_80 = arith.constant 0.000000e+00 : f32
      %169 = vector.broadcast %cst_80 : f32 to vector<8x128xf32>
      %c0_81 = arith.constant 0 : index
      %c0_82 = arith.constant 0 : index
      %170 = vector.load %arg11[%c0_81, %c0_82] : memref<8x128xf32, #tpu.memory_space<vmem>>, vector<8x128xf32>
      tpu.vector_store %arg11[%c0_81, %c0_82], %169 {strides = array<i32>} : memref<8x128xf32, #tpu.memory_space<vmem>>, vector<8x128xf32>,
    } else {
    }
    %c0 = arith.constant 0 : index
    %c0_1 = arith.constant 0 : index
    %c0_2 = arith.constant 0 : index
    %3 = vector.load %arg2[%c0, %c0_1, %c0_2] : memref<4x8x128xf32, #tpu.memory_space<vmem>>, vector<4x8x128xf32>
    %4 = vector.shape_cast %3 : vector<4x8x128xf32> to vector<32x128xf32>
    %c0_3 = arith.constant 0 : index
    %c0_4 = arith.constant 0 : index
    %5 = vector.load %arg3[%c0_3, %c0_4] : memref<128x512xf32, #tpu.memory_space<vmem>>, vector<128x512xf32>
    %cst = arith.constant dense<0.000000e+00> : vector<32x512xf32>
    %6 = tpu.matmul %4, %5, %cst {dimension_numbers = #tpu.dot_dimension_numbers<[1], [0], [0], [1], [0, 0, 1, 1], [], []>} : vector<32x128xf32>, vector<128x512xf32>, vector<32x512xf32> -> vector<32x512xf32>
    %c0_5 = arith.constant 0 : index
    %c0_6 = arith.constant 0 : index
    %7 = vector.load %arg5[%c0_5, %c0_6] : memref<1x512xf32, #tpu.memory_space<vmem>>, vector<1x512xf32>
    %8 = vector.broadcast %7 : vector<1x512xf32> to vector<32x512xf32>
    %9 = arith.addf %6, %8 : vector<32x512xf32>
    %10 = vector.shape_cast %9 : vector<32x512xf32> to vector<4x8x512xf32>
    %c0_7 = arith.constant 0 : index
    %c0_8 = arith.constant 0 : index
    %c0_9 = arith.constant 0 : index
    %11 = vector.load %arg9[%c0_7, %c0_8, %c0_9] : memref<4x8x512xf32, #tpu.memory_space<vmem>>, vector<4x8x512xf32>
    tpu.vector_store %arg9[%c0_7, %c0_8, %c0_9], %10 {strides = array<i32>} : memref<4x8x512xf32, #tpu.memory_space<vmem>>, vector<4x8x512xf32>,
    %c0_10 = arith.constant 0 : index
    %c0_11 = arith.constant 0 : index
    %12 = vector.load %arg10[%c0_10, %c0_11] : memref<8x128xf32, #tpu.memory_space<vmem>>, vector<8x128xf32>
    %c0_12 = arith.constant 0 : index
    %c0_13 = arith.constant 0 : index
    %13 = vector.load %arg11[%c0_12, %c0_13] : memref<8x128xf32, #tpu.memory_space<vmem>>, vector<8x128xf32>
    %c0_i32_14 = arith.constant 0 : i32
    %14 = arith.index_cast %c0_i32_14 : i32 to index
    %c0_15 = arith.constant 0 : index
    %c0_16 = arith.constant 0 : index
    %15 = vector.load %arg9[%14, %c0_15, %c0_16] : memref<4x8x512xf32, #tpu.memory_space<vmem>>, vector<1x8x512xf32>
    %16 = vector.shape_cast %15 : vector<1x8x512xf32> to vector<8x512xf32>
    %c0_17 = arith.constant 0 : index
    %c0_18 = arith.constant 0 : index
    %17 = vector.load %arg4[%c0_17, %c0_18] : memref<128x512xf32, #tpu.memory_space<vmem>>, vector<128x512xf32>
    %cst_19 = arith.constant dense<0.000000e+00> : vector<8x512xf32>
    %18 = tpu.matmul %12, %17, %cst_19 {dimension_numbers = #tpu.dot_dimension_numbers<[1], [0], [0], [1], [0, 0, 1, 1], [], []>} : vector<8x128xf32>, vector<128x512xf32>, vector<8x512xf32> -> vector<8x512xf32>
    %19 = arith.addf %16, %18 : vector<8x512xf32>
    %20 = vector.extract_strided_slice %19 {offsets = [0, 0], sizes = [8, 128], strides = [1, 1]} : vector<8x512xf32> to vector<8x128xf32>
    %cst_20 = arith.constant 5.000000e-01 : f32
    %21 = vector.broadcast %cst_20 : f32 to vector<8x128xf32>
    %22 = arith.mulf %21, %20 : vector<8x128xf32>
    %23 = math.tanh %22 : vector<8x128xf32>
    %cst_21 = arith.constant 5.000000e-01 : f32
    %24 = vector.broadcast %cst_21 : f32 to vector<8x128xf32>
    %25 = arith.mulf %24, %23 : vector<8x128xf32>
    %cst_22 = arith.constant 5.000000e-01 : f32
    %26 = vector.broadcast %cst_22 : f32 to vector<8x128xf32>
    %27 = arith.addf %25, %26 : vector<8x128xf32>
    %28 = vector.extract_strided_slice %19 {offsets = [0, 128], sizes = [8, 128], strides = [1, 1]} : vector<8x512xf32> to vector<8x128xf32>
    %cst_23 = arith.constant 5.000000e-01 : f32
    %29 = vector.broadcast %cst_23 : f32 to vector<8x128xf32>
    %30 = arith.mulf %29, %28 : vector<8x128xf32>
    %31 = math.tanh %30 : vector<8x128xf32>
    %cst_24 = arith.constant 5.000000e-01 : f32
    %32 = vector.broadcast %cst_24 : f32 to vector<8x128xf32>
    %33 = arith.mulf %32, %31 : vector<8x128xf32>
    %cst_25 = arith.constant 5.000000e-01 : f32
    %34 = vector.broadcast %cst_25 : f32 to vector<8x128xf32>
    %35 = arith.addf %33, %34 : vector<8x128xf32>
    %36 = vector.extract_strided_slice %19 {offsets = [0, 256], sizes = [8, 128], strides = [1, 1]} : vector<8x512xf32> to vector<8x128xf32>
    %37 = math.tanh %36 : vector<8x128xf32>
    %38 = vector.extract_strided_slice %19 {offsets = [0, 384], sizes = [8, 128], strides = [1, 1]} : vector<8x512xf32> to vector<8x128xf32>
    %cst_26 = arith.constant 5.000000e-01 : f32
    %39 = vector.broadcast %cst_26 : f32 to vector<8x128xf32>
    %40 = arith.mulf %39, %38 : vector<8x128xf32>
    %41 = math.tanh %40 : vector<8x128xf32>
    %cst_27 = arith.constant 5.000000e-01 : f32
    %42 = vector.broadcast %cst_27 : f32 to vector<8x128xf32>
    %43 = arith.mulf %42, %41 : vector<8x128xf32>
    %cst_28 = arith.constant 5.000000e-01 : f32
    %44 = vector.broadcast %cst_28 : f32 to vector<8x128xf32>
    %45 = arith.addf %43, %44 : vector<8x128xf32>
    %46 = arith.mulf %35, %13 : vector<8x128xf32>
    %47 = arith.mulf %27, %37 : vector<8x128xf32>
    %48 = arith.addf %46, %47 : vector<8x128xf32>
    %49 = math.tanh %48 : vector<8x128xf32>
    %50 = arith.mulf %45, %49 : vector<8x128xf32>
    %c1_i32 = arith.constant 1 : i32
    %51 = arith.index_cast %c1_i32 : i32 to index
    %c0_29 = arith.constant 0 : index
    %c0_30 = arith.constant 0 : index
    %52 = vector.load %arg9[%51, %c0_29, %c0_30] : memref<4x8x512xf32, #tpu.memory_space<vmem>>, vector<1x8x512xf32>
    %53 = vector.shape_cast %52 : vector<1x8x512xf32> to vector<8x512xf32>
    %c0_31 = arith.constant 0 : index
    %c0_32 = arith.constant 0 : index
    %54 = vector.load %arg4[%c0_31, %c0_32] : memref<128x512xf32, #tpu.memory_space<vmem>>, vector<128x512xf32>
    %cst_33 = arith.constant dense<0.000000e+00> : vector<8x512xf32>
    %55 = tpu.matmul %50, %54, %cst_33 {dimension_numbers = #tpu.dot_dimension_numbers<[1], [0], [0], [1], [0, 0, 1, 1], [], []>} : vector<8x128xf32>, vector<128x512xf32>, vector<8x512xf32> -> vector<8x512xf32>
    %56 = arith.addf %53, %55 : vector<8x512xf32>
    %57 = vector.extract_strided_slice %56 {offsets = [0, 0], sizes = [8, 128], strides = [1, 1]} : vector<8x512xf32> to vector<8x128xf32>
    %cst_34 = arith.constant 5.000000e-01 : f32
    %58 = vector.broadcast %cst_34 : f32 to vector<8x128xf32>
    %59 = arith.mulf %58, %57 : vector<8x128xf32>
    %60 = math.tanh %59 : vector<8x128xf32>
    %cst_35 = arith.constant 5.000000e-01 : f32
    %61 = vector.broadcast %cst_35 : f32 to vector<8x128xf32>
    %62 = arith.mulf %61, %60 : vector<8x128xf32>
    %cst_36 = arith.constant 5.000000e-01 : f32
    %63 = vector.broadcast %cst_36 : f32 to vector<8x128xf32>
    %64 = arith.addf %62, %63 : vector<8x128xf32>
    %65 = vector.extract_strided_slice %56 {offsets = [0, 128], sizes = [8, 128], strides = [1, 1]} : vector<8x512xf32> to vector<8x128xf32>
    %cst_37 = arith.constant 5.000000e-01 : f32
    %66 = vector.broadcast %cst_37 : f32 to vector<8x128xf32>
    %67 = arith.mulf %66, %65 : vector<8x128xf32>
    %68 = math.tanh %67 : vector<8x128xf32>
    %cst_38 = arith.constant 5.000000e-01 : f32
    %69 = vector.broadcast %cst_38 : f32 to vector<8x128xf32>
    %70 = arith.mulf %69, %68 : vector<8x128xf32>
    %cst_39 = arith.constant 5.000000e-01 : f32
    %71 = vector.broadcast %cst_39 : f32 to vector<8x128xf32>
    %72 = arith.addf %70, %71 : vector<8x128xf32>
    %73 = vector.extract_strided_slice %56 {offsets = [0, 256], sizes = [8, 128], strides = [1, 1]} : vector<8x512xf32> to vector<8x128xf32>
    %74 = math.tanh %73 : vector<8x128xf32>
    %75 = vector.extract_strided_slice %56 {offsets = [0, 384], sizes = [8, 128], strides = [1, 1]} : vector<8x512xf32> to vector<8x128xf32>
    %cst_40 = arith.constant 5.000000e-01 : f32
    %76 = vector.broadcast %cst_40 : f32 to vector<8x128xf32>
    %77 = arith.mulf %76, %75 : vector<8x128xf32>
    %78 = math.tanh %77 : vector<8x128xf32>
    %cst_41 = arith.constant 5.000000e-01 : f32
    %79 = vector.broadcast %cst_41 : f32 to vector<8x128xf32>
    %80 = arith.mulf %79, %78 : vector<8x128xf32>
    %cst_42 = arith.constant 5.000000e-01 : f32
    %81 = vector.broadcast %cst_42 : f32 to vector<8x128xf32>
    %82 = arith.addf %80, %81 : vector<8x128xf32>
    %83 = arith.mulf %72, %48 : vector<8x128xf32>
    %84 = arith.mulf %64, %74 : vector<8x128xf32>
    %85 = arith.addf %83, %84 : vector<8x128xf32>
    %86 = math.tanh %85 : vector<8x128xf32>
    %87 = arith.mulf %82, %86 : vector<8x128xf32>
    %c2_i32 = arith.constant 2 : i32
    %88 = arith.index_cast %c2_i32 : i32 to index
    %c0_43 = arith.constant 0 : index
    %c0_44 = arith.constant 0 : index
    %89 = vector.load %arg9[%88, %c0_43, %c0_44] : memref<4x8x512xf32, #tpu.memory_space<vmem>>, vector<1x8x512xf32>
    %90 = vector.shape_cast %89 : vector<1x8x512xf32> to vector<8x512xf32>
    %c0_45 = arith.constant 0 : index
    %c0_46 = arith.constant 0 : index
    %91 = vector.load %arg4[%c0_45, %c0_46] : memref<128x512xf32, #tpu.memory_space<vmem>>, vector<128x512xf32>
    %cst_47 = arith.constant dense<0.000000e+00> : vector<8x512xf32>
    %92 = tpu.matmul %87, %91, %cst_47 {dimension_numbers = #tpu.dot_dimension_numbers<[1], [0], [0], [1], [0, 0, 1, 1], [], []>} : vector<8x128xf32>, vector<128x512xf32>, vector<8x512xf32> -> vector<8x512xf32>
    %93 = arith.addf %90, %92 : vector<8x512xf32>
    %94 = vector.extract_strided_slice %93 {offsets = [0, 0], sizes = [8, 128], strides = [1, 1]} : vector<8x512xf32> to vector<8x128xf32>
    %cst_48 = arith.constant 5.000000e-01 : f32
    %95 = vector.broadcast %cst_48 : f32 to vector<8x128xf32>
    %96 = arith.mulf %95, %94 : vector<8x128xf32>
    %97 = math.tanh %96 : vector<8x128xf32>
    %cst_49 = arith.constant 5.000000e-01 : f32
    %98 = vector.broadcast %cst_49 : f32 to vector<8x128xf32>
    %99 = arith.mulf %98, %97 : vector<8x128xf32>
    %cst_50 = arith.constant 5.000000e-01 : f32
    %100 = vector.broadcast %cst_50 : f32 to vector<8x128xf32>
    %101 = arith.addf %99, %100 : vector<8x128xf32>
    %102 = vector.extract_strided_slice %93 {offsets = [0, 128], sizes = [8, 128], strides = [1, 1]} : vector<8x512xf32> to vector<8x128xf32>
    %cst_51 = arith.constant 5.000000e-01 : f32
    %103 = vector.broadcast %cst_51 : f32 to vector<8x128xf32>
    %104 = arith.mulf %103, %102 : vector<8x128xf32>
    %105 = math.tanh %104 : vector<8x128xf32>
    %cst_52 = arith.constant 5.000000e-01 : f32
    %106 = vector.broadcast %cst_52 : f32 to vector<8x128xf32>
    %107 = arith.mulf %106, %105 : vector<8x128xf32>
    %cst_53 = arith.constant 5.000000e-01 : f32
    %108 = vector.broadcast %cst_53 : f32 to vector<8x128xf32>
    %109 = arith.addf %107, %108 : vector<8x128xf32>
    %110 = vector.extract_strided_slice %93 {offsets = [0, 256], sizes = [8, 128], strides = [1, 1]} : vector<8x512xf32> to vector<8x128xf32>
    %111 = math.tanh %110 : vector<8x128xf32>
    %112 = vector.extract_strided_slice %93 {offsets = [0, 384], sizes = [8, 128], strides = [1, 1]} : vector<8x512xf32> to vector<8x128xf32>
    %cst_54 = arith.constant 5.000000e-01 : f32
    %113 = vector.broadcast %cst_54 : f32 to vector<8x128xf32>
    %114 = arith.mulf %113, %112 : vector<8x128xf32>
    %115 = math.tanh %114 : vector<8x128xf32>
    %cst_55 = arith.constant 5.000000e-01 : f32
    %116 = vector.broadcast %cst_55 : f32 to vector<8x128xf32>
    %117 = arith.mulf %116, %115 : vector<8x128xf32>
    %cst_56 = arith.constant 5.000000e-01 : f32
    %118 = vector.broadcast %cst_56 : f32 to vector<8x128xf32>
    %119 = arith.addf %117, %118 : vector<8x128xf32>
    %120 = arith.mulf %109, %85 : vector<8x128xf32>
    %121 = arith.mulf %101, %111 : vector<8x128xf32>
    %122 = arith.addf %120, %121 : vector<8x128xf32>
    %123 = math.tanh %122 : vector<8x128xf32>
    %124 = arith.mulf %119, %123 : vector<8x128xf32>
    %c3_i32 = arith.constant 3 : i32
    %125 = arith.index_cast %c3_i32 : i32 to index
    %c0_57 = arith.constant 0 : index
    %c0_58 = arith.constant 0 : index
    %126 = vector.load %arg9[%125, %c0_57, %c0_58] : memref<4x8x512xf32, #tpu.memory_space<vmem>>, vector<1x8x512xf32>
    %127 = vector.shape_cast %126 : vector<1x8x512xf32> to vector<8x512xf32>
    %c0_59 = arith.constant 0 : index
    %c0_60 = arith.constant 0 : index
    %128 = vector.load %arg4[%c0_59, %c0_60] : memref<128x512xf32, #tpu.memory_space<vmem>>, vector<128x512xf32>
    %cst_61 = arith.constant dense<0.000000e+00> : vector<8x512xf32>
    %129 = tpu.matmul %124, %128, %cst_61 {dimension_numbers = #tpu.dot_dimension_numbers<[1], [0], [0], [1], [0, 0, 1, 1], [], []>} : vector<8x128xf32>, vector<128x512xf32>, vector<8x512xf32> -> vector<8x512xf32>
    %130 = arith.addf %127, %129 : vector<8x512xf32>
    %131 = vector.extract_strided_slice %130 {offsets = [0, 0], sizes = [8, 128], strides = [1, 1]} : vector<8x512xf32> to vector<8x128xf32>
    %cst_62 = arith.constant 5.000000e-01 : f32
    %132 = vector.broadcast %cst_62 : f32 to vector<8x128xf32>
    %133 = arith.mulf %132, %131 : vector<8x128xf32>
    %134 = math.tanh %133 : vector<8x128xf32>
    %cst_63 = arith.constant 5.000000e-01 : f32
    %135 = vector.broadcast %cst_63 : f32 to vector<8x128xf32>
    %136 = arith.mulf %135, %134 : vector<8x128xf32>
    %cst_64 = arith.constant 5.000000e-01 : f32
    %137 = vector.broadcast %cst_64 : f32 to vector<8x128xf32>
    %138 = arith.addf %136, %137 : vector<8x128xf32>
    %139 = vector.extract_strided_slice %130 {offsets = [0, 128], sizes = [8, 128], strides = [1, 1]} : vector<8x512xf32> to vector<8x128xf32>
    %cst_65 = arith.constant 5.000000e-01 : f32
    %140 = vector.broadcast %cst_65 : f32 to vector<8x128xf32>
    %141 = arith.mulf %140, %139 : vector<8x128xf32>
    %142 = math.tanh %141 : vector<8x128xf32>
    %cst_66 = arith.constant 5.000000e-01 : f32
    %143 = vector.broadcast %cst_66 : f32 to vector<8x128xf32>
    %144 = arith.mulf %143, %142 : vector<8x128xf32>
    %cst_67 = arith.constant 5.000000e-01 : f32
    %145 = vector.broadcast %cst_67 : f32 to vector<8x128xf32>
    %146 = arith.addf %144, %145 : vector<8x128xf32>
    %147 = vector.extract_strided_slice %130 {offsets = [0, 256], sizes = [8, 128], strides = [1, 1]} : vector<8x512xf32> to vector<8x128xf32>
    %148 = math.tanh %147 : vector<8x128xf32>
    %149 = vector.extract_strided_slice %130 {offsets = [0, 384], sizes = [8, 128], strides = [1, 1]} : vector<8x512xf32> to vector<8x128xf32>
    %cst_68 = arith.constant 5.000000e-01 : f32
    %150 = vector.broadcast %cst_68 : f32 to vector<8x128xf32>
    %151 = arith.mulf %150, %149 : vector<8x128xf32>
    %152 = math.tanh %151 : vector<8x128xf32>
    %cst_69 = arith.constant 5.000000e-01 : f32
    %153 = vector.broadcast %cst_69 : f32 to vector<8x128xf32>
    %154 = arith.mulf %153, %152 : vector<8x128xf32>
    %cst_70 = arith.constant 5.000000e-01 : f32
    %155 = vector.broadcast %cst_70 : f32 to vector<8x128xf32>
    %156 = arith.addf %154, %155 : vector<8x128xf32>
    %157 = arith.mulf %146, %122 : vector<8x128xf32>
    %158 = arith.mulf %138, %148 : vector<8x128xf32>
    %159 = arith.addf %157, %158 : vector<8x128xf32>
    %160 = math.tanh %159 : vector<8x128xf32>
    %161 = arith.mulf %156, %160 : vector<8x128xf32>
    %c4_i32 = arith.constant 4 : i32
    %c0_71 = arith.constant 0 : index
    %c0_72 = arith.constant 0 : index
    %162 = vector.load %arg10[%c0_71, %c0_72] : memref<8x128xf32, #tpu.memory_space<vmem>>, vector<8x128xf32>
    tpu.vector_store %arg10[%c0_71, %c0_72], %161 {strides = array<i32>} : memref<8x128xf32, #tpu.memory_space<vmem>>, vector<8x128xf32>,
    %c0_73 = arith.constant 0 : index
    %c0_74 = arith.constant 0 : index
    %163 = vector.load %arg11[%c0_73, %c0_74] : memref<8x128xf32, #tpu.memory_space<vmem>>, vector<8x128xf32>
    tpu.vector_store %arg11[%c0_73, %c0_74], %159 {strides = array<i32>} : memref<8x128xf32, #tpu.memory_space<vmem>>, vector<8x128xf32>,
    %c1_i32_75 = arith.constant 1 : i32
    %164 = arith.cmpi eq, %arg1, %c1_i32_75 : i32
    %165 = arith.extui %164 : i1 to i32
    %c0_i32_76 = arith.constant 0 : i32
    %166 = arith.cmpi ne, %165, %c0_i32_76 : i32
    scf.if %166 {
      %c0_77 = arith.constant 0 : index
      %c0_78 = arith.constant 0 : index
      %167 = vector.load %arg6[%c0_77, %c0_78] : memref<128x128xf32, #tpu.memory_space<vmem>>, vector<128x128xf32>
      %cst_79 = arith.constant dense<0.000000e+00> : vector<8x128xf32>
      %168 = tpu.matmul %161, %167, %cst_79 {dimension_numbers = #tpu.dot_dimension_numbers<[1], [0], [0], [1], [0, 0, 1, 1], [], []>} : vector<8x128xf32>, vector<128x128xf32>, vector<8x128xf32> -> vector<8x128xf32>
      %c0_80 = arith.constant 0 : index
      %c0_81 = arith.constant 0 : index
      %169 = vector.load %arg7[%c0_80, %c0_81] : memref<1x128xf32, #tpu.memory_space<vmem>>, vector<1x128xf32>
      %170 = vector.broadcast %169 : vector<1x128xf32> to vector<8x128xf32>
      %171 = arith.addf %168, %170 : vector<8x128xf32>
      %c0_82 = arith.constant 0 : index
      %c0_83 = arith.constant 0 : index
      %172 = vector.load %arg8[%c0_82, %c0_83] : memref<8x128xf32, #tpu.memory_space<vmem>>, vector<8x128xf32>
      tpu.vector_store %arg8[%c0_82, %c0_83], %171 {strides = array<i32>} : memref<8x128xf32, #tpu.memory_space<vmem>>, vector<8x128xf32>,
    } else {
    }
    return
  }
  func.func @transform_0(%arg0: i32, %arg1: i32) -> (i32, i32, i32) {
    %c0_i32 = arith.constant 0 : i32
    %c0_i32_0 = arith.constant 0 : i32
    return %arg1, %arg0, %c0_i32 : i32, i32, i32
  }
  func.func @transform_1(%arg0: i32, %arg1: i32) -> (i32, i32) {
    %c0_i32 = arith.constant 0 : i32
    %c0_i32_0 = arith.constant 0 : i32
    %c0_i32_1 = arith.constant 0 : i32
    return %c0_i32, %c0_i32_0 : i32, i32
  }
  func.func @transform_2(%arg0: i32, %arg1: i32) -> (i32, i32) {
    %c0_i32 = arith.constant 0 : i32
    %c0_i32_0 = arith.constant 0 : i32
    %c0_i32_1 = arith.constant 0 : i32
    return %c0_i32, %c0_i32_0 : i32, i32
  }
  func.func @transform_3(%arg0: i32, %arg1: i32) -> (i32, i32) {
    %c0_i32 = arith.constant 0 : i32
    %c0_i32_0 = arith.constant 0 : i32
    %c0_i32_1 = arith.constant 0 : i32
    return %c0_i32, %c0_i32_0 : i32, i32
  }
  func.func @transform_4(%arg0: i32, %arg1: i32) -> (i32, i32) {
    %c0_i32 = arith.constant 0 : i32
    %c0_i32_0 = arith.constant 0 : i32
    %c0_i32_1 = arith.constant 0 : i32
    return %c0_i32, %c0_i32_0 : i32, i32
  }
  func.func @transform_5(%arg0: i32, %arg1: i32) -> (i32, i32) {
    %c0_i32 = arith.constant 0 : i32
    %c0_i32_0 = arith.constant 0 : i32
    %c0_i32_1 = arith.constant 0 : i32
    return %c0_i32, %c0_i32_0 : i32, i32
  }
  func.func @transform_6(%arg0: i32, %arg1: i32) -> (i32, i32) {
    %c0_i32 = arith.constant 0 : i32
    %c0_i32_0 = arith.constant 0 : i32
    return %arg0, %c0_i32 : i32, i32
  }
}

</mosaic_0001>

<bundles_post_ra>
// kernel: rnn_action_to_observation.1
= control target key start
LH: loop header
LB: loop body
LE: loop exit
PB: predicated region body
PF: predicated region fallthrough
CT: control target
= control target key end

     0   :  { %s2041_s21 = smov 0   ;;  %s2043_s22 = smov 0   ;;  %s2763_s0 = inlined_call_operand.vmem [shape: f32[8,8,128], index: 0, kind: input, shape index: {}]   ;;  %s2764_s1 = inlined_call_operand.vmem [shape: f32[128,512], index: 1, kind: input, shape index: {}]   ;;  %s2765_s2 = inlined_call_operand.vmem [shape: f32[128,512], index: 2, kind: input, shape index: {}]   ;;  %s2766_s3 = inlined_call_operand.vmem [shape: f32[1,512], index: 3, kind: input, shape index: {}]   ;;  %s2767_s4 = inlined_call_operand.vmem [shape: f32[128,128], index: 4, kind: input, shape index: {}]   ;;  %s2768_s5 = inlined_call_operand.vmem [shape: f32[1,128], index: 5, kind: input, shape index: {}]   ;;  %s2769_s6 = inlined_call_operand.vmem [shape: f32[8,128], index: 6, kind: output, shape index: {}]  }
   0x1   :  { %s2045_s23 = smov 0  }
   0x2 LB: > { %s25_s24 = sadd.s32 1, %s1995_s22  ;;  %p1471_p0 = scmp.ge.s32.totalorder %s1999_s23, 1  ;;  %s1999_s23 = sphi %s2045_s23, %s16_s23   ;;  %s1995_s22 = sphi %s2043_s22, %s2771_s22   ;;  %s1991_s21 = sphi %s2041_s21, %s2770_s21  }
   0x3   : > { %p26_p1 = scmp.ge.s32.totalorder %s25_s24, 2  ;;  %p230_p2 = scmp.lt.s32.totalorder %s1999_s23, 3 }
   0x5   : > { %s2773_s24 = smov (%p26_p1, %s25_s24), 0  ;;  %p231_p3 = pnand %p1471_p0, %p230_p2 }
   0x6   : > { %s1472_s25 = sshll.u32 (!%p231_p3), %s1991_s21, 2  ;;  %p1474_p5 = scmp.ne.s32.totalorder (!%p231_p3), %s1991_s21, 0 }
   0x7   : > { %234 = sbr.rel (%p231_p3) target bundleno = 1300 (0x514), region = 44  ;;  %p263_p4 = scmp.lt.s32.totalorder (!%p231_p3), %s1472_s25, 7 }
   0xe   : > { %s2775_s25 = smov (!%p263_p4, %s1472_s25), 7  ;;  %278 = sbr.rel (%p1474_p5) target bundleno = 21 (0x15), region = 48 }
   0xf   : > { %s1473_s26 = sshll.u32 %s2775_s25, 3  ;;  %v2001_v0 = vmov (!%p1474_p5), 0.0  }
  0x10   : > { %s2065_s29 = scalar_lea.vmem %s2763_s0, %s1473_s26  ;;  %279 = vst [vmem:[#allocation3] sm:$0xff] (!%p1474_p5), %v2001_v0  ;;  %280 = vst [vmem:[#allocation4] sm:$0xff] (!%p1474_p5), %v2001_v0 }
  0x15 PF: > { %v286_v1 = vld [vmem:[%s2764_s1 + $0x8] sm:$0xff]  ;;  %v288_v3 = vld [vmem:[%s2764_s1 + $0x18] sm:$0xff]  ;;  %v285_v6 = vld [vmem:[%s2764_s1] sm:$0xff]  ;;  %v2002_v8 = vmov 0.0   ;;  %p1475_p6 = scmp.ne.s32.totalorder %s1991_s21, 1 }
  0x16   : > { %v290_v2 = vld [vmem:[%s2764_s1 + $0x28] sm:$0xff]  ;;  %v292_v5 = vld [vmem:[%s2764_s1 + $0x38] sm:$0xff]  ;;  %v289_v7 = vld [vmem:[%s2764_s1 + $0x20] sm:$0xff]  ;;  %435 = vmatprep.mubr.f32.mxu0 %v2002_v8  ;;  %524 = vmatprep.mubr.f32.mxu1 %v2002_v8  ;;  %vm2004_vm0 = vmmov (!%p1475_p6), 0  }
  0x17   : > { %v1532_v4 = vpack.c.bf16 %v290_v2, %v286_v1  ;;  %v1564_v9 = vpack.c.bf16 %v292_v5, %v288_v3  ;;  %v1534_v10 = vpack.c.bf16 %v289_v7, %v285_v6  ;;  %v287_v11 = vld [vmem:[%s2764_s1 + $0x10] sm:$0xff]  ;;  %v294_v13 = vld [vmem:[%s2764_s1 + $0x48] sm:$0xff]  ;;  %v296_v16 = vld [vmem:[%s2764_s1 + $0x58] sm:$0xff] }
  0x18   : > { %v291_v12 = vld [vmem:[%s2764_s1 + $0x30] sm:$0xff]  ;;  %v298_v15 = vld [vmem:[%s2764_s1 + $0x68] sm:$0xff]  ;;  %v300_v17 = vld [vmem:[%s2764_s1 + $0x78] sm:$0xff] }
  0x19   : > { %1533 = vmatprep.subr.bf16.mxu0 %v1532_v4  ;;  %v1566_v14 = vpack.c.bf16 %v291_v12, %v287_v11  ;;  %1565 = vmatprep.subr.bf16.mxu1 %v1564_v9  ;;  %v1536_v18 = vpack.c.bf16 %v298_v15, %v294_v13  ;;  %v1568_v19 = vpack.c.bf16 %v300_v17, %v296_v16  ;;  %v293_v20 = vld [vmem:[%s2764_s1 + $0x40] sm:$0xff]  ;;  %v295_v22 = vld [vmem:[%s2764_s1 + $0x50] sm:$0xff]  ;;  %v302_v25 = vld [vmem:[%s2764_s1 + $0x88] sm:$0xff] }
  0x1a   : > { %1535 = vmatpush1.bf16.msra.mxu0 %v1534_v10  ;;  %v297_v21 = vld [vmem:[%s2764_s1 + $0x60] sm:$0xff]  ;;  %v299_v24 = vld [vmem:[%s2764_s1 + $0x70] sm:$0xff]  ;;  %v306_v26 = vld [vmem:[%s2764_s1 + $0xa8] sm:$0xff] }
  0x1b   : > { %1567 = vmatpush1.bf16.msra.mxu1 %v1566_v14  ;;  %v1538_v23 = vpack.c.bf16 %v297_v21, %v293_v20  ;;  %1537 = vmatprep.subr.bf16.mxu0 %v1536_v18  ;;  %v1570_v27 = vpack.c.bf16 %v299_v24, %v295_v22  ;;  %v1540_v28 = vpack.c.bf16 %v306_v26, %v302_v25  ;;  %v304_v29 = vld [vmem:[%s2764_s1 + $0x98] sm:$0xff]  ;;  %v301_v31 = vld [vmem:[%s2764_s1 + $0x80] sm:$0xff]  ;;  %v303_v34 = vld [vmem:[%s2764_s1 + $0x90] sm:$0xff] }
  0x1c   : > { %1569 = vmatprep.subr.bf16.mxu1 %v1568_v19  ;;  %v308_v30 = vld [vmem:[%s2764_s1 + $0xb8] sm:$0xff]  ;;  %v305_v33 = vld [vmem:[%s2764_s1 + $0xa0] sm:$0xff]  ;;  %v307_v35 = vld [vmem:[%s2764_s1 + $0xb0] sm:$0xff] }
  0x1d   : > { %v1572_v32 = vpack.c.bf16 %v308_v30, %v304_v29  ;;  %v1542_v36 = vpack.c.bf16 %v305_v33, %v301_v31  ;;  %v310_v37 = vld [vmem:[%s2764_s1 + $0xc8] sm:$0xff]  ;;  %v312_v39 = vld [vmem:[%s2764_s1 + $0xd8] sm:$0xff]  ;;  %v1574_v40 = vpack.c.bf16 %v307_v35, %v303_v34  ;;  %v309_v43 = vld [vmem:[%s2764_s1 + $0xc0] sm:$0xff] }
  0x1e   : > { %1539 = vmatpush1.bf16.msra.mxu0 %v1538_v23  ;;  %v314_v38 = vld [vmem:[%s2764_s1 + $0xe8] sm:$0xff]  ;;  %v316_v42 = vld [vmem:[%s2764_s1 + $0xf8] sm:$0xff]  ;;  %v313_v44 = vld [vmem:[%s2764_s1 + $0xe0] sm:$0xff] }
  0x1f   : > { %1571 = vmatpush1.bf16.msra.mxu1 %v1570_v27  ;;  %1541 = vmatprep.subr.bf16.mxu0 %v1540_v28  ;;  %v1544_v41 = vpack.c.bf16 %v314_v38, %v310_v37  ;;  %v1576_v45 = vpack.c.bf16 %v316_v42, %v312_v39  ;;  %v311_v46 = vld [vmem:[%s2764_s1 + $0xd0] sm:$0xff]  ;;  %v318_v48 = vld [vmem:[%s2764_s1 + $0x108] sm:$0xff]  ;;  %v320_v50 = vld [vmem:[%s2764_s1 + $0x118] sm:$0xff]  ;;  %v1546_v52 = vpack.c.bf16 %v313_v44, %v309_v43 }
  0x20   : > { %1573 = vmatprep.subr.bf16.mxu1 %v1572_v32  ;;  %v315_v47 = vld [vmem:[%s2764_s1 + $0xf0] sm:$0xff]  ;;  %v322_v49 = vld [vmem:[%s2764_s1 + $0x128] sm:$0xff]  ;;  %v324_v51 = vld [vmem:[%s2764_s1 + $0x138] sm:$0xff] }
  0x21   : > { %v1578_v53 = vpack.c.bf16 %v315_v47, %v311_v46  ;;  %v1548_v54 = vpack.c.bf16 %v322_v49, %v318_v48  ;;  %v317_v55 = vld [vmem:[%s2764_s1 + $0x100] sm:$0xff]  ;;  %v319_v57 = vld [vmem:[%s2764_s1 + $0x110] sm:$0xff]  ;;  %v1580_v58 = vpack.c.bf16 %v324_v51, %v320_v50  ;;  %v326_v60 = vld [vmem:[%s2764_s1 + $0x148] sm:$0xff] }
  0x22   : > { %1543 = vmatpush1.bf16.msra.mxu0 %v1542_v36  ;;  %v321_v56 = vld [vmem:[%s2764_s1 + $0x120] sm:$0xff]  ;;  %v323_v59 = vld [vmem:[%s2764_s1 + $0x130] sm:$0xff]  ;;  %v330_v61 = vld [vmem:[%s2764_s1 + $0x168] sm:$0xff] }
  0x23   : > { %1575 = vmatpush1.bf16.msra.mxu1 %v1574_v40  ;;  %1545 = vmatprep.subr.bf16.mxu0 %v1544_v41  ;;  %v328_v62 = vld [vmem:[%s2764_s1 + $0x158] sm:$0xff]  ;;  %v1550_v0 = vpack.c.bf16 %v321_v56, %v317_v55  ;;  %v1582_v1 = vpack.c.bf16 %v323_v59, %v319_v57  ;;  %v1552_v2 = vpack.c.bf16 %v330_v61, %v326_v60  ;;  %v325_v3 = vld [vmem:[%s2764_s1 + $0x140] sm:$0xff]  ;;  %v327_v5 = vld [vmem:[%s2764_s1 + $0x150] sm:$0xff] }
  0x24   : > { %1577 = vmatprep.subr.bf16.mxu1 %v1576_v45  ;;  %v332_v63 = vld [vmem:[%s2764_s1 + $0x178] sm:$0xff]  ;;  %v329_v4 = vld [vmem:[%s2764_s1 + $0x160] sm:$0xff]  ;;  %v331_v7 = vld [vmem:[%s2764_s1 + $0x170] sm:$0xff] }
  0x25   : > { %v1584_v6 = vpack.c.bf16 %v332_v63, %v328_v62  ;;  %v334_v9 = vld [vmem:[%s2764_s1 + $0x188] sm:$0xff]  ;;  %v336_v11 = vld [vmem:[%s2764_s1 + $0x198] sm:$0xff]  ;;  %v1554_v13 = vpack.c.bf16 %v329_v4, %v325_v3  ;;  %v1586_v14 = vpack.c.bf16 %v331_v7, %v327_v5  ;;  %v333_v16 = vld [vmem:[%s2764_s1 + $0x180] sm:$0xff] }
  0x26   : > { %1547 = vmatpush1.bf16.msra.mxu0 %v1546_v52  ;;  %v338_v10 = vld [vmem:[%s2764_s1 + $0x1a8] sm:$0xff]  ;;  %v340_v12 = vld [vmem:[%s2764_s1 + $0x1b8] sm:$0xff]  ;;  %v337_v17 = vld [vmem:[%s2764_s1 + $0x1a0] sm:$0xff] }
  0x27   : > { %1579 = vmatpush1.bf16.msra.mxu1 %v1578_v53  ;;  %1549 = vmatprep.subr.bf16.mxu0 %v1548_v54  ;;  %v1556_v15 = vpack.c.bf16 %v338_v10, %v334_v9  ;;  %v335_v18 = vld [vmem:[%s2764_s1 + $0x190] sm:$0xff]  ;;  %v1588_v19 = vpack.c.bf16 %v340_v12, %v336_v11  ;;  %v342_v21 = vld [vmem:[%s2764_s1 + $0x1c8] sm:$0xff]  ;;  %v344_v23 = vld [vmem:[%s2764_s1 + $0x1d8] sm:$0xff]  ;;  %v1558_v25 = vpack.c.bf16 %v337_v17, %v333_v16 }
  0x28   : > { %1581 = vmatprep.subr.bf16.mxu1 %v1580_v58  ;;  %v339_v20 = vld [vmem:[%s2764_s1 + $0x1b0] sm:$0xff]  ;;  %v346_v22 = vld [vmem:[%s2764_s1 + $0x1e8] sm:$0xff]  ;;  %v348_v24 = vld [vmem:[%s2764_s1 + $0x1f8] sm:$0xff] }
  0x29   : > { %v1590_v26 = vpack.c.bf16 %v339_v20, %v335_v18  ;;  %v1560_v27 = vpack.c.bf16 %v346_v22, %v342_v21  ;;  %v341_v28 = vld [vmem:[%s2764_s1 + $0x1c0] sm:$0xff]  ;;  %v343_v30 = vld [vmem:[%s2764_s1 + $0x1d0] sm:$0xff]  ;;  %v1592_v31 = vpack.c.bf16 %v348_v24, %v344_v23  ;;  %v572_v33 = vld [vmem:[%s2765_s2 + $0x8] sm:$0xff] }
  0x2a   : > { %1551 = vmatpush1.bf16.msra.mxu0 %v1550_v0  ;;  %v345_v29 = vld [vmem:[%s2764_s1 + $0x1e0] sm:$0xff]  ;;  %v347_v32 = vld [vmem:[%s2764_s1 + $0x1f0] sm:$0xff]  ;;  %v576_v34 = vld [vmem:[%s2765_s2 + $0x28] sm:$0xff] }
  0x2b   : > { %1583 = vmatpush1.bf16.msra.mxu1 %v1582_v1  ;;  %1553 = vmatprep.subr.bf16.mxu0 %v1552_v2  ;;  %v574_v35 = vld [vmem:[%s2765_s2 + $0x18] sm:$0xff]  ;;  %v1562_v37 = vpack.c.bf16 %v345_v29, %v341_v28  ;;  %v1594_v38 = vpack.c.bf16 %v347_v32, %v343_v30  ;;  %v2274_v39 = vpack.c.bf16 %v576_v34, %v572_v33  ;;  %v571_v40 = vld [vmem:[%s2765_s2] sm:$0xff]  ;;  %v573_v42 = vld [vmem:[%s2765_s2 + $0x10] sm:$0xff] }
  0x2c   : > { %1585 = vmatprep.subr.bf16.mxu1 %v1584_v6  ;;  %v578_v36 = vld [vmem:[%s2765_s2 + $0x38] sm:$0xff]  ;;  %v575_v41 = vld [vmem:[%s2765_s2 + $0x20] sm:$0xff]  ;;  %v577_v44 = vld [vmem:[%s2765_s2 + $0x30] sm:$0xff] }
  0x2d   : > { %v2285_v43 = vpack.c.bf16 %v578_v36, %v574_v35  ;;  %v580_v45 = vld [vmem:[%s2765_s2 + $0x48] sm:$0xff]  ;;  %v582_v47 = vld [vmem:[%s2765_s2 + $0x58] sm:$0xff]  ;;  %v281_v49 = vld [vmem:[%s2065_s29] sm:$0xff]  ;;  %v2303_v50 = vpack.c.bf16 %v575_v41, %v571_v40  ;;  %v2306_v51 = vpack.c.bf16 %v577_v44, %v573_v42 }
  0x2e   : > { %1555 = vmatpush1.bf16.msra.mxu0 %v1554_v13  ;;  %v584_v46 = vld [vmem:[%s2765_s2 + $0x68] sm:$0xff]  ;;  %v586_v48 = vld [vmem:[%s2765_s2 + $0x78] sm:$0xff]  ;;  %v579_v53 = vld [vmem:[%s2765_s2 + $0x40] sm:$0xff] }
  0x2f   : > { %1587 = vmatpush1.bf16.msra.mxu1 %v1586_v14  ;;  %1557 = vmatprep.subr.bf16.mxu0 %v1556_v15  ;;  %v2308_v52 = vpack.c.bf16 %v584_v46, %v580_v45  ;;  %v583_v54 = vld [vmem:[%s2765_s2 + $0x60] sm:$0xff]  ;;  %v581_v55 = vld [vmem:[%s2765_s2 + $0x50] sm:$0xff]  ;;  %v2320_v56 = vpack.c.bf16 %v586_v48, %v582_v47  ;;  %v588_v58 = vld [vmem:[%s2765_s2 + $0x88] sm:$0xff] }
  0x30   : > { %1589 = vmatprep.subr.bf16.mxu1 %v1588_v19  ;;  %v585_v57 = vld [vmem:[%s2765_s2 + $0x70] sm:$0xff]  ;;  %v592_v59 = vld [vmem:[%s2765_s2 + $0xa8] sm:$0xff]  ;;  %v590_v60 = vld [vmem:[%s2765_s2 + $0x98] sm:$0xff]  ;;  %v2338_v62 = vpack.c.bf16 %v583_v54, %v579_v53 }
  0x31   : > { %v594_v61 = vld [vmem:[%s2765_s2 + $0xb8] sm:$0xff]  ;;  %v282_v63 = vld [vmem:[%s2065_s29 + $0x8] sm:$0xff]  ;;  %v2343_v0 = vpack.c.bf16 %v585_v57, %v581_v55  ;;  %v2345_v1 = vpack.c.bf16 %v592_v59, %v588_v58  ;;  %v587_v2 = vld [vmem:[%s2765_s2 + $0x80] sm:$0xff] }
  0x32   : > { %1559 = vmatpush1.bf16.msra.mxu0 %v1558_v25  ;;  %v591_v3 = vld [vmem:[%s2765_s2 + $0xa0] sm:$0xff]  ;;  %v589_v4 = vld [vmem:[%s2765_s2 + $0x90] sm:$0xff]  ;;  %v2357_v5 = vpack.c.bf16 %v594_v61, %v590_v60  ;;  %v596_v7 = vld [vmem:[%s2765_s2 + $0xc8] sm:$0xff] }
  0x33   : > { %1591 = vmatpush1.bf16.msra.mxu1 %v1590_v26  ;;  %1561 = vmatprep.subr.bf16.mxu0 %v1560_v27  ;;  %v593_v6 = vld [vmem:[%s2765_s2 + $0xb0] sm:$0xff]  ;;  %v600_v9 = vld [vmem:[%s2765_s2 + $0xe8] sm:$0xff]  ;;  %v598_v10 = vld [vmem:[%s2765_s2 + $0xd8] sm:$0xff]  ;;  %v2377_v12 = vpack.c.bf16 %v591_v3, %v587_v2 }
  0x34   : > { %1593 = vmatprep.subr.bf16.mxu1 %v1592_v31  ;;  %v602_v11 = vld [vmem:[%s2765_s2 + $0xf8] sm:$0xff]  ;;  %v283_v13 = vld [vmem:[%s2065_s29 + $0x10] sm:$0xff]  ;;  %v2382_v14 = vpack.c.bf16 %v593_v6, %v589_v4  ;;  %v2384_v15 = vpack.c.bf16 %v600_v9, %v596_v7  ;;  %v595_v16 = vld [vmem:[%s2765_s2 + $0xc0] sm:$0xff] }
  0x35   : > { %v599_v17 = vld [vmem:[%s2765_s2 + $0xe0] sm:$0xff]  ;;  %v597_v18 = vld [vmem:[%s2765_s2 + $0xd0] sm:$0xff]  ;;  %v2396_v19 = vpack.c.bf16 %v602_v11, %v598_v10  ;;  %v604_v21 = vld [vmem:[%s2765_s2 + $0x108] sm:$0xff] }
  0x36   : > { %1563 = vmatpush1.bf16.msra.mxu0 %v1562_v37  ;;  %v601_v20 = vld [vmem:[%s2765_s2 + $0xf0] sm:$0xff]  ;;  %v608_v22 = vld [vmem:[%s2765_s2 + $0x128] sm:$0xff]  ;;  %v606_v23 = vld [vmem:[%s2765_s2 + $0x118] sm:$0xff]  ;;  %v2416_v25 = vpack.c.bf16 %v599_v17, %v595_v16 }
  0x37   : > { %1595 = vmatpush1.bf16.msra.mxu1 %v1594_v38  ;;  %1597 = vmatprep.subr.bf16.mxu0 %v2274_v39  ;;  %v610_v24 = vld [vmem:[%s2765_s2 + $0x138] sm:$0xff]  ;;  %v2421_v27 = vpack.c.bf16 %v601_v20, %v597_v18  ;;  %v2423_v28 = vpack.c.bf16 %v608_v22, %v604_v21  ;;  %v603_v29 = vld [vmem:[%s2765_s2 + $0x100] sm:$0xff]  ;;  %v605_v31 = vld [vmem:[%s2765_s2 + $0x110] sm:$0xff] }
  0x38   : > { %1629 = vmatprep.subr.bf16.mxu1 %v2285_v43  ;;  %v284_v26 = vld [vmem:[%s2065_s29 + $0x18] sm:$0xff]  ;;  %v607_v30 = vld [vmem:[%s2765_s2 + $0x120] sm:$0xff]  ;;  %v2435_v32 = vpack.c.bf16 %v610_v24, %v606_v23  ;;  %v609_v33 = vld [vmem:[%s2765_s2 + $0x130] sm:$0xff]  ;;  %v351_v24 = vlaneseq }
  0x39   : > { %436 = vmatmul.mubr.f32.vlgmr.msra.gmra.mrb[0].mxu0 %v281_v49  ;;  %v612_v34 = vld [vmem:[%s2765_s2 + $0x148] sm:$0xff]  ;;  %v614_v36 = vld [vmem:[%s2765_s2 + $0x158] sm:$0xff]  ;;  %v2455_v38 = vpack.c.bf16 %v607_v30, %v603_v29  ;;  %v2459_v40 = vpack.c.bf16 %v609_v33, %v605_v31  ;;  %v611_v42 = vld [vmem:[%s2765_s2 + $0x140] sm:$0xff] }
  0x3a   : > { %525 = vmatmul.mubr.f32.vlgmr.msra.gmra.mrb[0].mxu1 %v281_v49  ;;  %1599 = vmatpush1.bf16.msra.mxu0 %v2303_v50  ;;  %v616_v35 = vld [vmem:[%s2765_s2 + $0x168] sm:$0xff]  ;;  %v618_v37 = vld [vmem:[%s2765_s2 + $0x178] sm:$0xff]  ;;  %v615_v44 = vld [vmem:[%s2765_s2 + $0x160] sm:$0xff] }
  0x3b   : > { %1631 = vmatpush1.bf16.msra.mxu1 %v2306_v51  ;;  %1601 = vmatprep.subr.bf16.mxu0 %v2308_v52  ;;  %v2461_v41 = vpack.c.bf16 %v616_v35, %v612_v34  ;;  %v613_v45 = vld [vmem:[%s2765_s2 + $0x150] sm:$0xff]  ;;  %v2473_v46 = vpack.c.bf16 %v618_v37, %v614_v36  ;;  %v620_v48 = vld [vmem:[%s2765_s2 + $0x188] sm:$0xff]  ;;  %v622_v53 = vld [vmem:[%s2765_s2 + $0x198] sm:$0xff]  ;;  %v2493_v55 = vpack.c.bf16 %v615_v44, %v611_v42 }
  0x3c   : > { %1633 = vmatprep.subr.bf16.mxu1 %v2320_v56  ;;  %441 = vmatprep.mubr.f32.mxu0 %v2002_v8  ;;  %v617_v47 = vld [vmem:[%s2765_s2 + $0x170] sm:$0xff]  ;;  %v624_v49 = vld [vmem:[%s2765_s2 + $0x1a8] sm:$0xff]  ;;  %v626_v54 = vld [vmem:[%s2765_s2 + $0x1b8] sm:$0xff] }
  0x3d   : > { %530 = vmatprep.mubr.f32.mxu1 %v2002_v8  ;;  %442 = vmatmul.mubr.f32.gmra.mrb[2].mxu0 %v282_v63  ;;  %v2497_v57 = vpack.c.bf16 %v617_v47, %v613_v45  ;;  %v2499_v58 = vpack.c.bf16 %v624_v49, %v620_v48  ;;  %v619_v59 = vld [vmem:[%s2765_s2 + $0x180] sm:$0xff]  ;;  %v621_v61 = vld [vmem:[%s2765_s2 + $0x190] sm:$0xff]  ;;  %v628_v3 = vld [vmem:[%s2765_s2 + $0x1c8] sm:$0xff] }
  0x3e   : > { %1603 = vmatpush1.bf16.msra.mxu0 %v2338_v62  ;;  %531 = vmatmul.mubr.f32.gmra.mrb[2].mxu1 %v282_v63  ;;  %v623_v60 = vld [vmem:[%s2765_s2 + $0x1a0] sm:$0xff]  ;;  %v2511_v63 = vpack.c.bf16 %v626_v54, %v622_v53  ;;  %v625_v2 = vld [vmem:[%s2765_s2 + $0x1b0] sm:$0xff]  ;;  %v632_v4 = vld [vmem:[%s2765_s2 + $0x1e8] sm:$0xff] }
  0x3f   : > { %1635 = vmatpush1.bf16.msra.mxu1 %v2343_v0  ;;  %1605 = vmatprep.subr.bf16.mxu0 %v2345_v1  ;;  %v630_v6 = vld [vmem:[%s2765_s2 + $0x1d8] sm:$0xff]  ;;  %v2529_v9 = vpack.c.bf16 %v623_v60, %v619_v59  ;;  %v2533_v10 = vpack.c.bf16 %v625_v2, %v621_v61  ;;  %v2535_v11 = vpack.c.bf16 %v632_v4, %v628_v3  ;;  %v631_v16 = vld [vmem:[%s2765_s2 + $0x1e0] sm:$0xff]  ;;  %v629_v18 = vld [vmem:[%s2765_s2 + $0x1d0] sm:$0xff] }
  0x40   : > { %1637 = vmatprep.subr.bf16.mxu1 %v2357_v5  ;;  %447 = vmatprep.mubr.f32.mxu0 %v2002_v8  ;;  %v634_v7 = vld [vmem:[%s2765_s2 + $0x1f8] sm:$0xff]  ;;  %v633_v20 = vld [vmem:[%s2765_s2 + $0x1f0] sm:$0xff]  ;;  %v565_v23 = vld [vmem:[#allocation3] sm:$0xff] }
  0x41   : > { %536 = vmatprep.mubr.f32.mxu1 %v2002_v8  ;;  %448 = vmatmul.mubr.f32.gmra.mrb[4].mxu0 %v283_v13  ;;  %v2544_v17 = vpack.c.bf16 %v634_v7, %v630_v6  ;;  %v2557_v22 = vpack.c.bf16 %v633_v20, %v629_v18  ;;  %v349_v30 = vld [vmem:[%s2766_s3] sm:$0xf] }
  0x42   : > { %1607 = vmatpush1.bf16.msra.mxu0 %v2377_v12  ;;  %537 = vmatmul.mubr.f32.gmra.mrb[4].mxu1 %v283_v13  ;;  %v627_v13 = vld [vmem:[%s2765_s2 + $0x1c0] sm:$0xff] }
  0x43   : > { %1639 = vmatpush1.bf16.msra.mxu1 %v2382_v14  ;;  %1609 = vmatprep.subr.bf16.mxu0 %v2384_v15  ;;  %v2553_v21 = vpack.c.bf16 %v631_v16, %v627_v13  ;;  %v566_v16 = vld [vmem:[#allocation4] sm:$0xff] }
  0x44   : > { %1641 = vmatprep.subr.bf16.mxu1 %v2396_v19  ;;  %453 = vmatprep.mubr.f32.mxu0 %v2002_v8 }
  0x45   : > { %542 = vmatprep.mubr.f32.mxu1 %v2002_v8  ;;  %454 = vmatmul.mubr.f32.gmra.mrb[6].mxu0 %v284_v26 }
  0x46   : > { %1611 = vmatpush1.bf16.msra.mxu0 %v2416_v25  ;;  %543 = vmatmul.mubr.f32.gmra.mrb[6].mxu1 %v284_v26  ;;  %v352_v26 = vshrl.u32 %v351_v24, 7 }
  0x47   : > { %1643 = vmatpush1.bf16.msra.mxu1 %v2421_v27  ;;  %1613 = vmatprep.subr.bf16.mxu0 %v2423_v28 }
  0x48   : > { %1645 = vmatprep.subr.bf16.mxu1 %v2435_v32  ;;  %699 = vmatprep.mubr.f32.mxu0 %v2002_v8  ;;  %v353_v29 = vsub.s32 0, %v352_v26  ;;  %v357_v31 = vsub.s32 1, %v352_v26  ;;  %v361_v34 = vsub.s32 2, %v352_v26  ;;  %v365_v47 = vsub.s32 3, %v352_v26 }
  0x49   : > { %770 = vmatprep.mubr.f32.mxu1 %v2002_v8 }
  0x4a   : > { %1615 = vmatpush1.bf16.msra.mxu0 %v2455_v38  ;;  %v2601_v33 = vrot.slane %v349_v30, %v353_v29  ;;  %v2603_v35 = vrot.slane %v349_v30, %v357_v31  ;;  %v2606_v42 = vrot.slane %v349_v30, %v361_v34  ;;  %v2610_v60 = vrot.slane %v349_v30, %v365_v47 }
  0x4b   : > { %1647 = vmatpush1.bf16.msra.mxu1 %v2459_v40  ;;  %1617 = vmatprep.subr.bf16.mxu0 %v2461_v41 }
  0x4c   : > { %1649 = vmatprep.subr.bf16.mxu1 %v2473_v46 }
  0x4e   : > { %1619 = vmatpush1.bf16.msra.mxu0 %v2493_v55 }
  0x4f   : > { %1651 = vmatpush1.bf16.msra.mxu1 %v2497_v57  ;;  %1621 = vmatprep.subr.bf16.mxu0 %v2499_v58 }
  0x50   : > { %1653 = vmatprep.subr.bf16.mxu1 %v2511_v63 }
  0x52   : > { %1623 = vmatpush1.bf16.msra.mxu0 %v2529_v9 }
  0x53   : > { %1655 = vmatpush1.bf16.msra.mxu1 %v2533_v10  ;;  %1625 = vmatprep.subr.bf16.mxu0 %v2535_v11 }
  0x54   : > { %1657 = vmatprep.subr.bf16.mxu1 %v2544_v17 }
  0x56   : > { %1627 = vmatpush1.bf16.msra.mxu0 %v2553_v21 }
  0x57   : > { %1659 = vmatpush1.bf16.msra.mxu1 %v2557_v22  ;;  %1661 = vmatprep.subr.bf16.mxu0 %v2274_v39 }
  0x58   : > { %1693 = vmatprep.subr.bf16.mxu1 %v2285_v43 }
  0x59   : > { %700 = vmatmul.mubr.f32.vlgmr.msra.gmra.mrb[0].mxu0 %v565_v23 }
  0x5a   : > { %771 = vmatmul.mubr.f32.vlgmr.msra.gmra.mrb[0].mxu1 %v565_v23  ;;  %1663 = vmatpush1.bf16.msra.mxu0 %v2303_v50 }
  0x5b   : > { %1695 = vmatpush1.bf16.msra.mxu1 %v2306_v51  ;;  %1665 = vmatprep.subr.bf16.mxu0 %v2308_v52 }
  0x5c   : > { %1697 = vmatprep.subr.bf16.mxu1 %v2320_v56  ;;  %868 = vmatprep.mubr.f32.mxu0 %v2002_v8 }
  0x5d   : > { %939 = vmatprep.mubr.f32.mxu1 %v2002_v8 }
  0x5e   : > { %1667 = vmatpush1.bf16.msra.mxu0 %v2338_v62 }
  0x5f   : > { %1699 = vmatpush1.bf16.msra.mxu1 %v2343_v0  ;;  %1669 = vmatprep.subr.bf16.mxu0 %v2345_v1 }
  0x60   : > { %1701 = vmatprep.subr.bf16.mxu1 %v2357_v5 }
  0x62   : > { %1671 = vmatpush1.bf16.msra.mxu0 %v2377_v12 }
  0x63   : > { %1703 = vmatpush1.bf16.msra.mxu1 %v2382_v14  ;;  %1673 = vmatprep.subr.bf16.mxu0 %v2384_v15 }
  0x64   : > { %1705 = vmatprep.subr.bf16.mxu1 %v2396_v19 }
  0x66   : > { %1675 = vmatpush1.bf16.msra.mxu0 %v2416_v25 }
  0x67   : > { %1707 = vmatpush1.bf16.msra.mxu1 %v2421_v27  ;;  %1677 = vmatprep.subr.bf16.mxu0 %v2423_v28 }
  0x68   : > { %1709 = vmatprep.subr.bf16.mxu1 %v2435_v32 }
  0x6a   : > { %1679 = vmatpush1.bf16.msra.mxu0 %v2455_v38 }
  0x6b   : > { %1711 = vmatpush1.bf16.msra.mxu1 %v2459_v40  ;;  %1681 = vmatprep.subr.bf16.mxu0 %v2461_v41 }
  0x6c   : > { %1713 = vmatprep.subr.bf16.mxu1 %v2473_v46 }
  0x6e   : > { %1683 = vmatpush1.bf16.msra.mxu0 %v2493_v55 }
  0x6f   : > { %1715 = vmatpush1.bf16.msra.mxu1 %v2497_v57  ;;  %1685 = vmatprep.subr.bf16.mxu0 %v2499_v58 }
  0x70   : > { %1717 = vmatprep.subr.bf16.mxu1 %v2511_v63 }
  0x72   : > { %1687 = vmatpush1.bf16.msra.mxu0 %v2529_v9 }
  0x73   : > { %1719 = vmatpush1.bf16.msra.mxu1 %v2533_v10  ;;  %1689 = vmatprep.subr.bf16.mxu0 %v2535_v11 }
  0x74   : > { %1721 = vmatprep.subr.bf16.mxu1 %v2544_v17 }
  0x76   : > { %1691 = vmatpush1.bf16.msra.mxu0 %v2553_v21 }
  0x77   : > { %1723 = vmatpush1.bf16.msra.mxu1 %v2557_v22  ;;  %1725 = vmatprep.subr.bf16.mxu0 %v2274_v39 }
  0x78   : > { %1757 = vmatprep.subr.bf16.mxu1 %v2285_v43 }
 0x12c   : > { %v701_v36 = vpop.f32.mrb[0].mxu0 }
 0x12d   : > { %v1876_v37 = vadd.f32 %v701_v36, %v2601_v33  ;;  %v772_v44 = vpop.f32.mrb[0].mxu1  ;;  %v703_v45 = vpop.f32.mrb[1].mxu0 }
 0x12e   : > { %v1877_v48 = vadd.f32 %v703_v45, %v2603_v35  ;;  %v774_v49 = vpop.f32.mrb[1].mxu1  ;;  %v1884_v59 = vadd.f32 %v772_v44, %v2606_v42 }
 0x12f   : > { %v781_v53 = vmul.f32 0.5, %v1876_v37  ;;  %v1885_v61 = vadd.f32 %v774_v49, %v2610_v60 }
 0x130   : > { %v785_v54 = vmul.f32 0.5, %v1877_v48 }
 0x131   : > { %1937 = vtanh.f32 %v781_v53  ;;  %v790_v2 = vmul.f32 0.5, %v1885_v61 }
 0x132   : > { %1939 = vtanh.f32 %v785_v54 }
 0x133   : > { %1941 = vtanh.f32 %v1884_v59 }
 0x134   : > { %1943 = vtanh.f32 %v790_v2 }
 0x13b   : > { %v1938_v3 = vpop.eup %1937 }
 0x13c   : > { %v1940_v4 = vpop.eup %1939  ;;  %v783_v6 = vmul.f32 0.5, %v1938_v3 }
 0x13d   : > { %v787_v7 = vmul.f32 0.5, %v1940_v4  ;;  %v1942_v18 = vpop.eup %1941 }
 0x13e   : > { %v784_v13 = vadd.f32 0.5, %v783_v6  ;;  %v1944_v29 = vpop.eup %1943 }
 0x13f   : > { %v788_v20 = vadd.f32 0.5, %v787_v7  ;;  %v792_v30 = vmul.f32 0.5, %v1944_v29 }
 0x140   : > { %v795_v23 = vmul.f32 %v1942_v18, %v784_v13 }
 0x141   : > { %v794_v24 = vmul.f32 %v788_v20, %v566_v16  ;;  %v793_v31 = vadd.f32 0.5, %v792_v30 }
 0x143   : > { %v2613_v26 = vadd.f32 %v795_v23, %v794_v24 }
 0x145   : > { %1945 = vtanh.f32 %v2613_v26 }
 0x14f   : > { %v1946_v34 = vpop.eup %1945 }
 0x150   : > { %v798_v36 = vmul.f32 %v1946_v34, %v793_v31 }
 0x152   : > { %869 = vmatmul.mubr.f32.vlgmr.msra.gmra.mrb[2].mxu0 %v798_v36  ;;  %940 = vmatmul.mubr.f32.vlgmr.msra.gmra.mrb[2].mxu1 %v798_v36 }
 0x153   : > { %1727 = vmatpush1.bf16.msra.mxu0 %v2303_v50  ;;  %1759 = vmatpush1.bf16.msra.mxu1 %v2306_v51 }
 0x154   : > { %1729 = vmatprep.subr.bf16.mxu0 %v2308_v52  ;;  %1761 = vmatprep.subr.bf16.mxu1 %v2320_v56 }
 0x155   : > { %1037 = vmatprep.mubr.f32.mxu0 %v2002_v8  ;;  %1108 = vmatprep.mubr.f32.mxu1 %v2002_v8 }
 0x157   : > { %1731 = vmatpush1.bf16.msra.mxu0 %v2338_v62  ;;  %1763 = vmatpush1.bf16.msra.mxu1 %v2343_v0 }
 0x158   : > { %1733 = vmatprep.subr.bf16.mxu0 %v2345_v1  ;;  %1765 = vmatprep.subr.bf16.mxu1 %v2357_v5 }
 0x15b   : > { %1735 = vmatpush1.bf16.msra.mxu0 %v2377_v12  ;;  %1767 = vmatpush1.bf16.msra.mxu1 %v2382_v14 }
 0x15c   : > { %1737 = vmatprep.subr.bf16.mxu0 %v2384_v15  ;;  %1769 = vmatprep.subr.bf16.mxu1 %v2396_v19 }
 0x15f   : > { %1739 = vmatpush1.bf16.msra.mxu0 %v2416_v25  ;;  %1771 = vmatpush1.bf16.msra.mxu1 %v2421_v27 }
 0x160   : > { %1741 = vmatprep.subr.bf16.mxu0 %v2423_v28  ;;  %1773 = vmatprep.subr.bf16.mxu1 %v2435_v32 }
 0x163   : > { %1743 = vmatpush1.bf16.msra.mxu0 %v2455_v38  ;;  %1775 = vmatpush1.bf16.msra.mxu1 %v2459_v40 }
 0x164   : > { %1745 = vmatprep.subr.bf16.mxu0 %v2461_v41  ;;  %1777 = vmatprep.subr.bf16.mxu1 %v2473_v46 }
 0x167   : > { %1747 = vmatpush1.bf16.msra.mxu0 %v2493_v55  ;;  %1779 = vmatpush1.bf16.msra.mxu1 %v2497_v57 }
 0x168   : > { %1749 = vmatprep.subr.bf16.mxu0 %v2499_v58  ;;  %1781 = vmatprep.subr.bf16.mxu1 %v2511_v63 }
 0x16b   : > { %1751 = vmatpush1.bf16.msra.mxu0 %v2529_v9  ;;  %1783 = vmatpush1.bf16.msra.mxu1 %v2533_v10 }
 0x16c   : > { %1753 = vmatprep.subr.bf16.mxu0 %v2535_v11  ;;  %1785 = vmatprep.subr.bf16.mxu1 %v2544_v17 }
 0x16f   : > { %1755 = vmatpush1.bf16.msra.mxu0 %v2553_v21  ;;  %1787 = vmatpush1.bf16.msra.mxu1 %v2557_v22 }
 0x170   : > { %1789 = vmatprep.subr.bf16.mxu0 %v2274_v39  ;;  %1821 = vmatprep.subr.bf16.mxu1 %v2285_v43 }
 0x225   : > { %v870_v37 = vpop.f32.mrb[2].mxu0  ;;  %v941_v44 = vpop.f32.mrb[2].mxu1 }
 0x226   : > { %v1878_v45 = vadd.f32 %v870_v37, %v2601_v33  ;;  %v872_v47 = vpop.f32.mrb[3].mxu0  ;;  %v943_v48 = vpop.f32.mrb[3].mxu1  ;;  %v1886_v59 = vadd.f32 %v941_v44, %v2606_v42 }
 0x227   : > { %v1879_v49 = vadd.f32 %v872_v47, %v2603_v35  ;;  %v1887_v61 = vadd.f32 %v943_v48, %v2610_v60 }
 0x228   : > { %v950_v53 = vmul.f32 0.5, %v1878_v45 }
 0x229   : > { %v954_v54 = vmul.f32 0.5, %v1879_v49  ;;  %v959_v39 = vmul.f32 0.5, %v1887_v61 }
 0x22a   : > { %1947 = vtanh.f32 %v950_v53 }
 0x22b   : > { %1949 = vtanh.f32 %v954_v54 }
 0x22c   : > { %1951 = vtanh.f32 %v1886_v59 }
 0x22d   : > { %1953 = vtanh.f32 %v959_v39 }
 0x234   : > { %v1948_v2 = vpop.eup %1947 }
 0x235   : > { %v1950_v43 = vpop.eup %1949  ;;  %v952_v3 = vmul.f32 0.5, %v1948_v2 }
 0x236   : > { %v956_v4 = vmul.f32 0.5, %v1950_v43  ;;  %v1952_v7 = vpop.eup %1951 }
 0x237   : > { %v953_v6 = vadd.f32 0.5, %v952_v3  ;;  %v1954_v23 = vpop.eup %1953 }
 0x238   : > { %v957_v13 = vadd.f32 0.5, %v956_v4  ;;  %v961_v24 = vmul.f32 0.5, %v1954_v23 }
 0x239   : > { %v964_v16 = vmul.f32 %v1952_v7, %v953_v6  ;;  %v1313_v6 = vld [vmem:[%s2767_s4 + $0x8] sm:$0xff] (!%p1475_p6)  ;;  %v1314_v7 = vld [vmem:[%s2767_s4 + $0x10] sm:$0xff] (!%p1475_p6) }
 0x23a   : > { %v963_v18 = vmul.f32 %v957_v13, %v2613_v26  ;;  %v962_v29 = vadd.f32 0.5, %v961_v24  ;;  %v2003_v13 = vmov (!%p1475_p6), 0.0|0.0   ;;  %v1316_v24 = vld [vmem:[%s2767_s4 + $0x20] sm:$0xff] (!%p1475_p6) }
 0x23c   : > { %v2655_v20 = vadd.f32 %v964_v16, %v963_v18  ;;  %v1315_v18 = vld [vmem:[%s2767_s4 + $0x18] sm:$0xff] (!%p1475_p6) }
 0x23d   : > { %v1856_v23 = vpack.c.bf16 (!%p1475_p6), %v1315_v18, %v1314_v7 }
 0x23e   : > { %1955 = vtanh.f32 %v2655_v20 }
 0x248   : > { %v1956_v30 = vpop.eup %1955 }
 0x249   : > { %v967_v31 = vmul.f32 %v1956_v30, %v962_v29  ;;  %v1317_v29 = vld [vmem:[%s2767_s4 + $0x28] sm:$0xff] (!%p1475_p6) }
 0x24a   : > { %v1859_v30 = vpack.c.bf16 (!%p1475_p6), %v1317_v29, %v1316_v24 }
 0x24b   : > { %1038 = vmatmul.mubr.f32.vlgmr.msra.gmra.mrb[4].mxu0 %v967_v31  ;;  %1109 = vmatmul.mubr.f32.vlgmr.msra.gmra.mrb[4].mxu1 %v967_v31  ;;  %v1318_v31 = vld [vmem:[%s2767_s4 + $0x30] sm:$0xff] (!%p1475_p6) }
 0x24c   : > { %1791 = vmatpush1.bf16.msra.mxu0 %v2303_v50  ;;  %1823 = vmatpush1.bf16.msra.mxu1 %v2306_v51 }
 0x24d   : > { %1793 = vmatprep.subr.bf16.mxu0 %v2308_v52  ;;  %1825 = vmatprep.subr.bf16.mxu1 %v2320_v56 }
 0x24e   : > { %1206 = vmatprep.mubr.f32.mxu0 %v2002_v8  ;;  %1277 = vmatprep.mubr.f32.mxu1 %v2002_v8 }
 0x250   : > { %1795 = vmatpush1.bf16.msra.mxu0 %v2338_v62  ;;  %1827 = vmatpush1.bf16.msra.mxu1 %v2343_v0 }
 0x251   : > { %1797 = vmatprep.subr.bf16.mxu0 %v2345_v1  ;;  %1829 = vmatprep.subr.bf16.mxu1 %v2357_v5 }
 0x254   : > { %1799 = vmatpush1.bf16.msra.mxu0 %v2377_v12  ;;  %1831 = vmatpush1.bf16.msra.mxu1 %v2382_v14 }
 0x255   : > { %1801 = vmatprep.subr.bf16.mxu0 %v2384_v15  ;;  %1833 = vmatprep.subr.bf16.mxu1 %v2396_v19 }
 0x258   : > { %1803 = vmatpush1.bf16.msra.mxu0 %v2416_v25  ;;  %1835 = vmatpush1.bf16.msra.mxu1 %v2421_v27 }
 0x259   : > { %1805 = vmatprep.subr.bf16.mxu0 %v2423_v28  ;;  %1837 = vmatprep.subr.bf16.mxu1 %v2435_v32 }
 0x25c   : > { %1807 = vmatpush1.bf16.msra.mxu0 %v2455_v38  ;;  %1839 = vmatpush1.bf16.msra.mxu1 %v2459_v40 }
 0x25d   : > { %1809 = vmatprep.subr.bf16.mxu0 %v2461_v41  ;;  %1841 = vmatprep.subr.bf16.mxu1 %v2473_v46 }
 0x260   : > { %1811 = vmatpush1.bf16.msra.mxu0 %v2493_v55  ;;  %1843 = vmatpush1.bf16.msra.mxu1 %v2497_v57 }
 0x261   : > { %1813 = vmatprep.subr.bf16.mxu0 %v2499_v58  ;;  %1845 = vmatprep.subr.bf16.mxu1 %v2511_v63 }
 0x264   : > { %1815 = vmatpush1.bf16.msra.mxu0 %v2529_v9  ;;  %1847 = vmatpush1.bf16.msra.mxu1 %v2533_v10 }
 0x265   : > { %1817 = vmatprep.subr.bf16.mxu0 %v2535_v11  ;;  %1849 = vmatprep.subr.bf16.mxu1 %v2544_v17 }
 0x268   : > { %1819 = vmatpush1.bf16.msra.mxu0 %v2553_v21  ;;  %1851 = vmatpush1.bf16.msra.mxu1 %v2557_v22 }
 0x269   : > { %1852 = vmatprep.subr.bf16.mxu0 (!%p1475_p6), %v2003_v13 }
 0x31e   : > { %v1039_v8 = vpop.f32.mrb[4].mxu0  ;;  %v1110_v50 = vpop.f32.mrb[4].mxu1 }
 0x31f   : > { %v1880_v51 = vadd.f32 %v1039_v8, %v2601_v33  ;;  %v1041_v52 = vpop.f32.mrb[5].mxu0  ;;  %v1112_v56 = vpop.f32.mrb[5].mxu1  ;;  %v1888_v5 = vadd.f32 %v1110_v50, %v2606_v42  ;;  %v1319_v8 = vld [vmem:[%s2767_s4 + $0x38] sm:$0xff] (!%p1475_p6) }
 0x320   : > { %v1881_v62 = vadd.f32 %v1041_v52, %v2603_v35  ;;  %v1889_v12 = vadd.f32 %v1112_v56, %v2610_v60  ;;  %v1862_v50 = vpack.c.bf16 (!%p1475_p6), %v1319_v8, %v1318_v31  ;;  %v1321_v52 = vld [vmem:[%s2767_s4 + $0x48] sm:$0xff] (!%p1475_p6) }
 0x321   : > { %v1119_v0 = vmul.f32 0.5, %v1880_v51  ;;  %v1320_v51 = vld [vmem:[%s2767_s4 + $0x40] sm:$0xff] (!%p1475_p6) }
 0x322   : > { %v1123_v1 = vmul.f32 0.5, %v1881_v62  ;;  %v1128_v14 = vmul.f32 0.5, %v1889_v12  ;;  %v1865_v56 = vpack.c.bf16 (!%p1475_p6), %v1321_v52, %v1320_v51  ;;  %v1322_v62 = vld [vmem:[%s2767_s4 + $0x50] sm:$0xff] (!%p1475_p6)  ;;  %v1325_v12 = vld [vmem:[%s2767_s4 + $0x68] sm:$0xff] (!%p1475_p6) }
 0x323   : > { %1957 = vtanh.f32 %v1119_v0  ;;  %v1323_v0 = vld [vmem:[%s2767_s4 + $0x58] sm:$0xff] (!%p1475_p6) }
 0x324   : > { %1959 = vtanh.f32 %v1123_v1  ;;  %v1868_v1 = vpack.c.bf16 (!%p1475_p6), %v1323_v0, %v1322_v62 }
 0x325   : > { %1961 = vtanh.f32 %v1888_v5  ;;  %v1324_v5 = vld [vmem:[%s2767_s4 + $0x60] sm:$0xff] (!%p1475_p6) }
 0x326   : > { %1963 = vtanh.f32 %v1128_v14  ;;  %v1871_v14 = vpack.c.bf16 (!%p1475_p6), %v1325_v12, %v1324_v5 }
 0x32d   : > { %v1958_v15 = vpop.eup %1957 }
 0x32e   : > { %v1960_v19 = vpop.eup %1959  ;;  %v1121_v25 = vmul.f32 0.5, %v1958_v15  ;;  %v1326_v15 = vld [vmem:[%s2767_s4 + $0x70] sm:$0xff] (!%p1475_p6) }
 0x32f   : > { %v1125_v27 = vmul.f32 0.5, %v1960_v19  ;;  %v1962_v32 = vpop.eup %1961  ;;  %v1327_v19 = vld [vmem:[%s2767_s4 + $0x78] sm:$0xff] (!%p1475_p6) }
 0x330   : > { %v1122_v28 = vadd.f32 0.5, %v1121_v25  ;;  %v1964_v55 = vpop.eup %1963  ;;  %v1874_v25 = vpack.c.bf16 (!%p1475_p6), %v1327_v19, %v1326_v15 }
 0x331   : > { %v1126_v38 = vadd.f32 0.5, %v1125_v27  ;;  %v1130_v57 = vmul.f32 0.5, %v1964_v55  ;;  %v1476_v27 = vld [vmem:[%s2768_s5] ss:$0 sm:$0xff] (!%p1475_p6) }
 0x332   : > { %v1133_v40 = vmul.f32 %v1962_v32, %v1122_v28 }
 0x333   : > { %v1132_v41 = vmul.f32 %v1126_v38, %v2655_v20  ;;  %v1131_v58 = vadd.f32 0.5, %v1130_v57  ;;  %v2005_v20 = vmov (!%p1475_p6), 0.0  }
 0x335   : > { %v1134_v46 = vadd.f32 %v1133_v40, %v1132_v41 }
 0x337   : > { %1965 = vtanh.f32 %v1134_v46 }
 0x341   : > { %v1966_v63 = vpop.eup %1965 }
 0x342   : > { %v1136_v9 = vmul.f32 %v1966_v63, %v1131_v58 }
 0x344   : > { %1207 = vmatmul.mubr.f32.vlgmr.msra.gmra.mrb[6].mxu0 %v1136_v9  ;;  %1278 = vmatmul.mubr.f32.vlgmr.msra.gmra.mrb[6].mxu1 %v1136_v9 }
 0x345   : > { %1529 = vmatprep.mubr.msk.f32.mxu0 (!%p1475_p6), %vm2004_vm0, %v2005_v20 }
 0x417   : > { %v1208_v10 = vpop.f32.mrb[6].mxu0  ;;  %v1279_v11 = vpop.f32.mrb[6].mxu1 }
 0x418   : > { %v1882_v17 = vadd.f32 %v1208_v10, %v2601_v33  ;;  %v1210_v21 = vpop.f32.mrb[7].mxu0  ;;  %v1281_v22 = vpop.f32.mrb[7].mxu1  ;;  %v1890_v37 = vadd.f32 %v1279_v11, %v2606_v42 }
 0x419   : > { %v1883_v26 = vadd.f32 %v1210_v21, %v2603_v35  ;;  %v1891_v44 = vadd.f32 %v1281_v22, %v2610_v60  ;;  %v1312_v60 = vld [vmem:[%s2767_s4] sm:$0xff] (!%p1475_p6) }
 0x41a   : > { %v1288_v34 = vmul.f32 0.5, %v1882_v17  ;;  %v1853_v16 = vpack.c.bf16 (!%p1475_p6), %v1313_v6, %v1312_v60 }
 0x41b   : > { %v1292_v36 = vmul.f32 0.5, %v1883_v26  ;;  %v1297_v45 = vmul.f32 0.5, %v1891_v44 }
 0x41c   : > { %1967 = vtanh.f32 %v1288_v34  ;;  %1854 = vmatpush3.bf16.msra.mxu0 (!%p1475_p6), %v1853_v16 }
 0x41d   : > { %1969 = vtanh.f32 %v1292_v36  ;;  %1855 = vmatprep.subr.bf16.mxu0 (!%p1475_p6), %v2003_v13 }
 0x41e   : > { %1971 = vtanh.f32 %v1890_v37 }
 0x41f   : > { %1973 = vtanh.f32 %v1297_v45 }
 0x420   : > { %1857 = vmatpush3.bf16.msra.mxu0 (!%p1475_p6), %v1856_v23 }
 0x421   : > { %1858 = vmatprep.subr.bf16.mxu0 (!%p1475_p6), %v2003_v13 }
 0x424   : > { %1860 = vmatpush3.bf16.msra.mxu0 (!%p1475_p6), %v1859_v30 }
 0x425   : > { %1861 = vmatprep.subr.bf16.mxu0 (!%p1475_p6), %v2003_v13 }
 0x426   : > { %v1968_v47 = vpop.eup %1967 }
 0x427   : > { %v1970_v48 = vpop.eup %1969  ;;  %v1290_v49 = vmul.f32 0.5, %v1968_v47 }
 0x428   : > { %v1294_v53 = vmul.f32 0.5, %v1970_v48  ;;  %v1972_v54 = vpop.eup %1971  ;;  %1863 = vmatpush3.bf16.msra.mxu0 (!%p1475_p6), %v1862_v50 }
 0x429   : > { %v1291_v33 = vadd.f32 0.5, %v1290_v49  ;;  %v1974_v2 = vpop.eup %1973  ;;  %1864 = vmatprep.subr.bf16.mxu0 (!%p1475_p6), %v2003_v13 }
 0x42a   : > { %v1295_v59 = vadd.f32 0.5, %v1294_v53  ;;  %v1299_v42 = vmul.f32 0.5, %v1974_v2 }
 0x42b   : > { %v1302_v61 = vmul.f32 %v1972_v54, %v1291_v33 }
 0x42c   : > { %v1301_v35 = vmul.f32 %v1295_v59, %v1134_v46  ;;  %v1300_v43 = vadd.f32 0.5, %v1299_v42  ;;  %1866 = vmatpush3.bf16.msra.mxu0 (!%p1475_p6), %v1865_v56 }
 0x42d   : > { %1867 = vmatprep.subr.bf16.mxu0 (!%p1475_p6), %v2003_v13 }
 0x42e   : > { %v1303_v39 = vadd.f32 %v1302_v61, %v1301_v35 }
 0x430   : > { %1975 = vtanh.f32 %v1303_v39  ;;  %1307 = vst [vmem:[#allocation4] sm:$0xff] %v1303_v39  ;;  %1869 = vmatpush3.bf16.msra.mxu0 (!%p1475_p6), %v1868_v1 }
 0x431   : > { %1870 = vmatprep.subr.bf16.mxu0 (!%p1475_p6), %v2003_v13 }
 0x434   : > { %1872 = vmatpush3.bf16.msra.mxu0 (!%p1475_p6), %v1871_v14 }
 0x435   : > { %1873 = vmatprep.subr.bf16.mxu0 (!%p1475_p6), %v2003_v13 }
 0x437   : > { %1311 = sbr.rel (%p1475_p6) target bundleno = 1300 (0x514), region = 52 }
 0x438   : > { %1875 = vmatpush3.bf16.msra.mxu0 (!%p1475_p6), %v1874_v25 }
 0x43a   : > { %v1976_v3 = vpop.eup %1975 }
 0x43b   : > { %v1305_v4 = vmul.f32 %v1976_v3, %v1300_v43 }
 0x43d   : > { %1306 = vst [vmem:[#allocation3] sm:$0xff] %v1305_v4  ;;  %1530 = vmatmul.mubr.f32.vlgmr.msra.gmra.mrb[0].mxu0 (!%p1475_p6), %v1305_v4 }
 0x510   : > { %v1401_v28 = vpop.f32.mrb[0].mxu0 }
 0x511   : > { %v1402_v32 = vadd.f32 %v1476_v27, %v1401_v28  ;;  %v1531_v38 = vpop.f32.mrb[1].mxu0 }
 0x513   : > { %1405 = vst [vmem:[%s2769_s6] sm:$0xff] %v1402_v32 }
 0x514 PF: > { %s16_s23 = sadd.s32 1, %s1999_s23   ;;  %s2770_s21 = smov %s1995_s22 }
 0x515   : > { %p13_p7 = scmp.ge.s32.totalorder %s16_s23, 4   ;;  %s2771_s22 = smov %s2773_s24 }
 0x517   :  { %15 = sbr.rel (!%p13_p7) target bundleno = 2 (0x2), region = 85 }

</bundles_post_ra>
